<compile_context>
chip_gen: v7x
topology: tpu7x:2x2x1
jax: 0.10.0
libtpu: 0.0.40
codegen_flags: <defaults>
</compile_context>

<pallas_src>
import numpy as np
import jax
import jax.numpy as jnp
from jax.experimental import pallas as pl
from jax.experimental.pallas import tpu as pltpu


def _round_up(x, m):
    return ((x + m - 1) // m) * m


# ----------------------------------------------------------------------------
# Host-side one-time parameter preprocessing: every Conv1d becomes a matmul
# against an "effective" weight matrix on the channel-major flattened layout.
# ----------------------------------------------------------------------------
def _conv1d_effective(w, b, Lin, stride, pad):
    """w:(Cout,Cin,K), b:(Cout,) -> A:(Cin*Lin, Cout*T), beff:(Cout*T,), T."""
    w = np.asarray(w, np.float32)
    b = np.asarray(b, np.float32)
    Cout, Cin, K = w.shape
    T = (Lin + 2 * pad - K) // stride + 1
    A = np.zeros((Cin * Lin, Cout * T), np.float32)
    for o in range(Cout):
        for t in range(T):
            for k in range(K):
                l = t * stride + k - pad
                if 0 <= l < Lin:
                    A[np.arange(Cin) * Lin + l, o * T + t] += w[o, :, k]
    return A, np.repeat(b, T).astype(np.float32), T


def _pool_conv_effective(w, b, C, L, pool_k, pool_s, conv_s, conv_pad):
    """MaxPool1d(pool_k, pool_s) -> Conv1d(w, stride=conv_s, padding=conv_pad),
    expressed as a matmul on the sliding-window max "candidate" vector
        cand[c*L + l] = max(x[c, l : l + pool_k]),  0 <= l < C*L - (pool_k - 1)
    since pooled[c, p] == cand[c*L + pool_s*p] (only every pool_s-th row used).
    """
    w = np.asarray(w, np.float32)
    b = np.asarray(b, np.float32)
    Cout, Cin, K = w.shape
    assert Cin == C
    Tp = (L - pool_k) // pool_s + 1
    T = (Tp + 2 * conv_pad - K) // conv_s + 1
    PW = C * L - (pool_k - 1)
    A = np.zeros((PW, Cout * T), np.float32)
    for o in range(Cout):
        for t in range(T):
            for k in range(K):
                p = t * conv_s + k - conv_pad
                if 0 <= p < Tp:
                    A[np.arange(C) * L + pool_s * p, o * T + t] += w[o, :, k]
    return A, np.repeat(b, T).astype(np.float32), T


# ----------------------------------------------------------------------------
# Pallas kernel: 2 fused MXU matmuls + VPU maxpool + fused bias/ReLU store
# ----------------------------------------------------------------------------
def _make_inception_kernel(cand_width):
    def kernel(xf_ref, ws1_ref, ws2h_ref, ws2p_ref, ball_ref, out_ref):
        xf = xf_ref[...]                                        # (TN, C*L) bf16

        # Stage 1: first convs of branches 1/2/3 fused into one wide matmul.
        h = jnp.dot(xf, ws1_ref[...], preferred_element_type=jnp.float32)
        h = h.astype(jnp.bfloat16)

        # Branch 4 MaxPool1d(k=3, s=4) candidates: VPU max of 3 shifted views
        # (the stride-4 window selection is baked into ws2p's sparsity).
        xa = xf_ref[:, pl.ds(0, cand_width)]
        xb = xf_ref[:, pl.ds(1, cand_width)]
        xc = xf_ref[:, pl.ds(2, cand_width)]
        cand = jnp.maximum(jnp.maximum(xa, xb), xc)

        # Stage 2: block-diagonal second convs (+ identity pass-through of
        # branch 1) and branch-4 conv, accumulated in f32.
        acc = jnp.dot(h, ws2h_ref[...], preferred_element_type=jnp.float32)
        acc = acc + jnp.dot(cand, ws2p_ref[...],
                            preferred_element_type=jnp.float32)

        # Fused bias + ReLU, single lane-dense (multiple-of-128) f32 store.
        out_ref[...] = jnp.maximum(acc + ball_ref[...], 0.0)

    return kernel


def inception_2d_pallas(x, params):
    """x: (N, C, L) float32 -> (N, c1+c2+c3+c4, T) float32 (torch semantics)."""
    if x.ndim == 2:              # torch 2-D path: concat along dim 0 == channels
        return inception_2d_pallas(x[None], params)[0]

    N, C, L = x.shape
    (w1, b1), (w2a, b2a), (w2b, b2b), (w3a, b3a), (w3b, b3b), (w4, b4) = params

    # ---- effective matrices (host-side, one-time) ----
    A1, B1, T1 = _conv1d_effective(w1, b1, L, stride=16, pad=0)
    A2a, B2a, T2a = _conv1d_effective(w2a, b2a, L, stride=4, pad=0)
    A2b, B2b, T2b = _conv1d_effective(w2b, b2b, T2a, stride=4, pad=1)
    A3a, B3a, T3a = _conv1d_effective(w3a, b3a, L, stride=4, pad=0)
    A3b, B3b, T3b = _conv1d_effective(w3b, b3b, T3a, stride=4, pad=1)
    A4, B4, T4 = _pool_conv_effective(w4, b4, C, L, pool_k=3, pool_s=4,
                                      conv_s=4, conv_pad=3)
    assert T1 == T2b == T3b == T4, "branch output lengths must match for concat"
    T = T1
    c1, c2, c3, c4 = w1.shape[0], w2b.shape[0], w3b.shape[0], w4.shape[0]
    Ctot = c1 + c2 + c3 + c4
    OUTW = Ctot * T
    OUTW_pad = _round_up(OUTW, 128)

    n1, n2, n3 = A1.shape[1], A2a.shape[1], A3a.shape[1]
    HW_pad = _round_up(n1 + n2 + n3, 128)
    CL = C * L
    PW = CL - 2

    # Stage-1 fused weight [A1 | A2a | A3a], zero-padded to lane-dense width.
    Ws1 = np.zeros((CL, HW_pad), np.float32)
    Ws1[:, :n1] = A1
    Ws1[:, n1:n1 + n2] = A2a
    Ws1[:, n1 + n2:n1 + n2 + n3] = A3a

    # Stage-2 block-diagonal weight: identity (branch 1), A2b, A3b blocks.
    co2, co3, co4 = c1 * T, (c1 + c2) * T, (c1 + c2 + c3) * T
    Ws2h = np.zeros((HW_pad, OUTW_pad), np.float32)
    Ws2h[:n1, :n1] = np.eye(n1, dtype=np.float32)
    Ws2h[n1:n1 + n2, co2:co2 + c2 * T] = A2b
    Ws2h[n1 + n2:n1 + n2 + n3, co3:co3 + c3 * T] = A3b

    # Stage-2 branch-4 weight acting on the maxpool candidate vector.
    Ws2p = np.zeros((PW, OUTW_pad), np.float32)
    Ws2p[:, co4:co4 + c4 * T] = A4

    # All biases folded into one row (first-conv biases propagated through the
    # *linear* second convs).
    Ball = np.zeros((1, OUTW_pad), np.float32)
    Ball[0, :c1 * T] = B1
    Ball[0, co2:co2 + c2 * T] = B2b + B2a @ A2b
    Ball[0, co3:co3 + c3 * T] = B3b + B3a @ A3b
    Ball[0, co4:co4 + c4 * T] = B4

    # ---- batch tiling: grid over N (8-row aligned), weights VMEM-resident ----
    TN = min(256, _round_up(N, 8))
    N_pad = _round_up(N, TN)
    xf = jnp.zeros((N_pad, CL), jnp.bfloat16).at[:N].set(
        x.reshape(N, CL).astype(jnp.bfloat16))

    ws1 = jnp.asarray(Ws1, jnp.bfloat16)
    ws2h = jnp.asarray(Ws2h, jnp.bfloat16)
    ws2p = jnp.asarray(Ws2p, jnp.bfloat16)
    ball = jnp.asarray(Ball, jnp.float32)

    # Explicit VMEM budget: resident weights + double-buffered xf/out tiles.
    weight_bytes = (ws1.size + ws2h.size + ws2p.size) * 2 + ball.size * 4
    tile_bytes = 2 * (TN * CL * 2 + TN * OUTW_pad * 4)
    vmem_limit = int(min(48 * 2**20,
                         max(4 * (weight_bytes + tile_bytes), 16 * 2**20)))

    out = pl.pallas_call(
        _make_inception_kernel(PW),
        out_shape=jax.ShapeDtypeStruct((N_pad, OUTW_pad), jnp.float32),
        grid=(pl.cdiv(N_pad, TN),),
        in_specs=[
            pl.BlockSpec((TN, CL), lambda i: (i, 0)),            # batch tile
            pl.BlockSpec((CL, HW_pad), lambda i: (0, 0)),        # resident W
            pl.BlockSpec((HW_pad, OUTW_pad), lambda i: (0, 0)),  # resident W
            pl.BlockSpec((PW, OUTW_pad), lambda i: (0, 0)),      # resident W
            pl.BlockSpec((1, OUTW_pad), lambda i: (0, 0)),       # resident bias
        ],
        out_specs=pl.BlockSpec((TN, OUTW_pad), lambda i: (i, 0)),
        compiler_params=pltpu.CompilerParams(
            dimension_semantics=("parallel",),
            vmem_limit_bytes=vmem_limit),
    )(xf, ws1, ws2h, ws2p, ball)

    return out[:N, :OUTW].reshape(N, Ctot, T)


# ----------------------------------------------------------------------------
# Pure-JAX reference (correctness check only)
# ----------------------------------------------------------------------------
def _conv1d_ref(x, w, b, stride, pad):
    out = jax.lax.conv_general_dilated(
        x, w, window_strides=(stride,), padding=[(pad, pad)],
        dimension_numbers=("NCH", "OIH", "NCH"))
    return out + b[None, :, None]


def inception_2d_ref(x, params):
    (w1, b1), (w2a, b2a), (w2b, b2b), (w3a, b3a), (w3b, b3b), (w4, b4) = params
    p1 = _conv1d_ref(x, w1, b1, 16, 0)
    p2 = _conv1d_ref(_conv1d_ref(x, w2a, b2a, 4, 0), w2b, b2b, 4, 1)
    p3 = _conv1d_ref(_conv1d_ref(x, w3a, b3a, 4, 0), w3b, b3b, 4, 1)
    pooled = jax.lax.reduce_window(x, -jnp.inf, jax.lax.max,
                                   window_dimensions=(1, 1, 3),
                                   window_strides=(1, 1, 4), padding="VALID")
    p4 = _conv1d_ref(pooled, w4, b4, 4, 3)
    return jax.nn.relu(jnp.concatenate([p1, p2, p3, p4], axis=1))


# ----------------------------------------------------------------------------
if __name__ == "__main__":
    N, C_in, L = 2, 4, 128          # L=128 makes all 4 branches emit T=8
    cp1, cp2, cp3, cp4 = [4], [4, 4], [4, 4], [4]

    key = jax.random.PRNGKey(0)
    keys = jax.random.split(key, 13)
    x = jax.random.normal(keys[0], (N, C_in, L), jnp.float32)

    def init(kw, kb, cout, cin, ksz):
        w = 0.1 * jax.random.normal(kw, (cout, cin, ksz), jnp.float32)
        b = 0.1 * jax.random.normal(kb, (cout,), jnp.float32)
        return w, b

    params = (
        init(keys[1], keys[2], cp1[0], C_in, 8),      # p1 conv
        init(keys[3], keys[4], cp2[0], C_in, 4),      # p2 conv a
        init(keys[5], keys[6], cp2[1], cp2[0], 6),    # p2 conv b
        init(keys[7], keys[8], cp3[0], C_in, 8),      # p3 conv a
        init(keys[9], keys[10], cp3[1], cp3[0], 4),   # p3 conv b
        init(keys[11], keys[12], cp4[0], C_in, 10),   # p4 conv
    )

    out = inception_2d_pallas(x, params)
    out = jax.block_until_ready(out)

    # Loose tolerance: kernel matmul operands are bf16 (f32 accumulation),
    # reference is pure f32.
    ref = inception_2d_ref(x, params)
    np.testing.assert_allclose(np.asarray(out), np.asarray(ref),
                               rtol=5e-2, atol=5e-2)

    print("KERNEL_OK")
</pallas_src>

<mosaic_0001>
module attributes {stable_mosaic.version = 11 : i64} {
  func.func @kernel(%arg0: i32, %arg1: memref<8x512xbf16, #tpu.memory_space<vmem>>, %arg2: memref<512x384xbf16, #tpu.memory_space<vmem>>, %arg3: memref<384x128xbf16, #tpu.memory_space<vmem>>, %arg4: memref<510x128xbf16, #tpu.memory_space<vmem>>, %arg5: memref<1x128xf32, #tpu.memory_space<vmem>>, %arg6: memref<8x128xf32, #tpu.memory_space<vmem>>) attributes {dimension_semantics = [#tpu.dimension_semantics<parallel>], iteration_bounds = array<i64: 1>, scalar_prefetch = 0 : i64, scratch_operands = 0 : i64, tpu.core_type = #tpu.core_type<tc>, window_params = [{transform_indices = @transform_0, window_bounds = array<i64: 8, 512>}, {pipeline_mode = #tpu.pipeline_mode<synchronous>, transform_indices = @transform_1, window_bounds = array<i64: 512, 384>}, {pipeline_mode = #tpu.pipeline_mode<synchronous>, transform_indices = @transform_2, window_bounds = array<i64: 384, 128>}, {pipeline_mode = #tpu.pipeline_mode<synchronous>, transform_indices = @transform_3, window_bounds = array<i64: 510, 128>}, {pipeline_mode = #tpu.pipeline_mode<synchronous>, transform_indices = @transform_4, window_bounds = array<i64: 1, 128>}, {transform_indices = @transform_5, window_bounds = array<i64: 8, 128>}]} {
    %c0 = arith.constant 0 : index
    %c0_0 = arith.constant 0 : index
    %0 = vector.load %arg1[%c0, %c0_0] : memref<8x512xbf16, #tpu.memory_space<vmem>>, vector<8x512xbf16>
    %c0_1 = arith.constant 0 : index
    %c0_2 = arith.constant 0 : index
    %1 = vector.load %arg2[%c0_1, %c0_2] : memref<512x384xbf16, #tpu.memory_space<vmem>>, vector<512x384xbf16>
    %cst = arith.constant dense<0.000000e+00> : vector<8x384xf32>
    %2 = tpu.matmul %0, %1, %cst {dimension_numbers = #tpu.dot_dimension_numbers<[1], [0], [0], [1], [0, 0, 1, 1], [], []>} : vector<8x512xbf16>, vector<512x384xbf16>, vector<8x384xf32> -> vector<8x384xf32>
    %3 = arith.truncf %2 : vector<8x384xf32> to vector<8x384xbf16>
    %c0_3 = arith.constant 0 : index
    %c0_4 = arith.constant 0 : index
    %4 = vector.load %arg1[%c0_3, %c0_4] : memref<8x512xbf16, #tpu.memory_space<vmem>>, vector<8x510xbf16>
    %c0_5 = arith.constant 0 : index
    %c1 = arith.constant 1 : index
    %5 = vector.load %arg1[%c0_5, %c1] : memref<8x512xbf16, #tpu.memory_space<vmem>>, vector<8x510xbf16>
    %c0_6 = arith.constant 0 : index
    %c2 = arith.constant 2 : index
    %6 = vector.load %arg1[%c0_6, %c2] : memref<8x512xbf16, #tpu.memory_space<vmem>>, vector<8x510xbf16>
    %7 = arith.maximumf %4, %5 : vector<8x510xbf16>
    %8 = arith.maximumf %7, %6 : vector<8x510xbf16>
    %c0_7 = arith.constant 0 : index
    %c0_8 = arith.constant 0 : index
    %9 = vector.load %arg3[%c0_7, %c0_8] : memref<384x128xbf16, #tpu.memory_space<vmem>>, vector<384x128xbf16>
    %cst_9 = arith.constant dense<0.000000e+00> : vector<8x128xf32>
    %10 = tpu.matmul %3, %9, %cst_9 {dimension_numbers = #tpu.dot_dimension_numbers<[1], [0], [0], [1], [0, 0, 1, 1], [], []>} : vector<8x384xbf16>, vector<384x128xbf16>, vector<8x128xf32> -> vector<8x128xf32>
    %c0_10 = arith.constant 0 : index
    %c0_11 = arith.constant 0 : index
    %11 = vector.load %arg4[%c0_10, %c0_11] : memref<510x128xbf16, #tpu.memory_space<vmem>>, vector<510x128xbf16>
    %cst_12 = arith.constant dense<0.000000e+00> : vector<8x128xf32>
    %12 = tpu.matmul %8, %11, %cst_12 {dimension_numbers = #tpu.dot_dimension_numbers<[1], [0], [0], [1], [0, 0, 1, 1], [], []>} : vector<8x510xbf16>, vector<510x128xbf16>, vector<8x128xf32> -> vector<8x128xf32>
    %13 = arith.addf %10, %12 : vector<8x128xf32>
    %c0_13 = arith.constant 0 : index
    %c0_14 = arith.constant 0 : index
    %14 = vector.load %arg5[%c0_13, %c0_14] : memref<1x128xf32, #tpu.memory_space<vmem>>, vector<1x128xf32>
    %15 = vector.broadcast %14 : vector<1x128xf32> to vector<8x128xf32>
    %16 = arith.addf %13, %15 : vector<8x128xf32>
    %cst_15 = arith.constant 0.000000e+00 : f32
    %17 = vector.broadcast %cst_15 : f32 to vector<8x128xf32>
    %18 = arith.maximumf %16, %17 : vector<8x128xf32>
    %c0_16 = arith.constant 0 : index
    %c0_17 = arith.constant 0 : index
    %19 = vector.load %arg6[%c0_16, %c0_17] : memref<8x128xf32, #tpu.memory_space<vmem>>, vector<8x128xf32>
    tpu.vector_store %arg6[%c0_16, %c0_17], %18 {strides = array<i32>} : memref<8x128xf32, #tpu.memory_space<vmem>>, vector<8x128xf32>,
    return
  }
  func.func @transform_0(%arg0: i32) -> (i32, i32) {
    %c0_i32 = arith.constant 0 : i32
    %c0_i32_0 = arith.constant 0 : i32
    return %arg0, %c0_i32 : i32, i32
  }
  func.func @transform_1(%arg0: i32) -> (i32, i32) {
    %c0_i32 = arith.constant 0 : i32
    %c0_i32_0 = arith.constant 0 : i32
    %c0_i32_1 = arith.constant 0 : i32
    return %c0_i32, %c0_i32_0 : i32, i32
  }
  func.func @transform_2(%arg0: i32) -> (i32, i32) {
    %c0_i32 = arith.constant 0 : i32
    %c0_i32_0 = arith.constant 0 : i32
    %c0_i32_1 = arith.constant 0 : i32
    return %c0_i32, %c0_i32_0 : i32, i32
  }
  func.func @transform_3(%arg0: i32) -> (i32, i32) {
    %c0_i32 = arith.constant 0 : i32
    %c0_i32_0 = arith.constant 0 : i32
    %c0_i32_1 = arith.constant 0 : i32
    return %c0_i32, %c0_i32_0 : i32, i32
  }
  func.func @transform_4(%arg0: i32) -> (i32, i32) {
    %c0_i32 = arith.constant 0 : i32
    %c0_i32_0 = arith.constant 0 : i32
    %c0_i32_1 = arith.constant 0 : i32
    return %c0_i32, %c0_i32_0 : i32, i32
  }
  func.func @transform_5(%arg0: i32) -> (i32, i32) {
    %c0_i32 = arith.constant 0 : i32
    %c0_i32_0 = arith.constant 0 : i32
    return %arg0, %c0_i32 : i32, i32
  }
}

</mosaic_0001>

<bundles_post_ra>
// kernel: tpu_custom_call.1
= control target key start
LH: loop header
LB: loop body
LE: loop exit
PB: predicated region body
PF: predicated region fallthrough
CT: control target
= control target key end

     0   :  { %10 = vsyncpa [#allocation3], 0  ;;  %s2340_s0 = inlined_call_operand.hbm [shape: bf16[8,512], index: 0, kind: input, shape index: {}]   ;;  %s2341_s1 = inlined_call_operand.hbm [shape: bf16[512,384], index: 1, kind: input, shape index: {}]   ;;  %s2342_s2 = inlined_call_operand.hbm [shape: bf16[384,128], index: 2, kind: input, shape index: {}]   ;;  %s2343_s3 = inlined_call_operand.hbm [shape: bf16[510,128], index: 3, kind: input, shape index: {}]   ;;  %s2344_s4 = inlined_call_operand.vmem [shape: f32[1,128], index: 4, kind: input, shape index: {}]   ;;  %s2345_s5 = inlined_call_operand.hbm [shape: f32[8,128], index: 5, kind: output, shape index: {}]  }
   0x1   :  { %11 = vsyncpa [#allocation6], 0 }
   0x2   :  { %12 = vsyncpa [#allocation9], 0 }
   0x3   :  { %13 = vsyncpa [#allocation4], 0  ;;  %s2205_s18 = smov [#allocation5]   ;;  %s2087_s22 = scalar_lea.hbm %s2341_s1, 12288 }
   0x4   :  { %s29_s19 = sshll.u32 %s2205_s18, 4  ;;  %p2088_p0 = scmp.ne.s32.totalorder %s2341_s1, %s2087_s22  ;;  %s30_s19 = int_to_ptr.vmem [resolvable:$true] %s29_s19 }
   0x5   :  { %p2091_p1 = scmp.lt.u32.totalorder %s2087_s22, %s2341_s1 }
   0x7   :  { %p2093_p2 = pnand %p2091_p1, %p2088_p0 }
   0x9   :  { %2096 = shalt.err (!%p2093_p2)
}
   0xa   :  { %s2097_s27 = scalar_lea.vmem %s30_s19, 12288  ;;  %p2102_p4 = scmp.lt.s32.totalorder %s30_s19, %s30_s19 }
   0xb   :  { %p2098_p3 = scmp.ne.s32.totalorder %s30_s19, %s2097_s27  ;;  %p2103_p5 = scmp.lt.s32.totalorder %s2097_s27, %s2097_s27 }
   0xd   :  { %p2104_p6 = por %p2103_p5, %p2102_p4 }
   0xf   :  { %p2105_p7 = pnand %p2104_p6, %p2098_p3 }
  0x11   :  { %2108 = shalt.err (!%p2105_p7)
}
  0x12   :  { %s2206_s28 = smov 192   ;;  %s2207_s29 = smov 12  }
  0x13   :  { %35 = dma.hbm_to_vmem [thread:$0]  %s2341_s1, 12288, %s30_s19, [#allocation6], %s2206_s28, %s2206_s28, %s2207_s29  }
  0x14   :  { %s2208_s7 = smov [#allocation2]   ;;  %s2209_s9 = smov [#allocation7]  }
  0x15   :  { %s20_s8 = sshll.u32 %s2208_s7, 4  ;;  %s41_s10 = sshll.u32 %s2209_s9, 4  ;;  %s21_s8 = int_to_ptr.vmem [resolvable:$true] %s20_s8  ;;  %s42_s10 = int_to_ptr.vmem [resolvable:$true] %s41_s10 }
  0x16   :  { %s2109_s13 = scalar_lea.hbm %s2340_s0, 256 }
  0x17   :  { %p2110_p8 = scmp.ne.s32.totalorder %s2340_s0, %s2109_s13  ;;  %p2113_p9 = scmp.lt.u32.totalorder %s2109_s13, %s2340_s0 }
  0x19   :  { %p2115_p10 = pnand %p2113_p9, %p2110_p8 }
  0x1b   :  { %2118 = shalt.err (!%p2115_p10)
}
  0x1c   :  { %s2119_s1 = scalar_lea.vmem %s21_s8, 256  ;;  %p2124_p12 = scmp.lt.s32.totalorder %s21_s8, %s21_s8 }
  0x1d   :  { %p2120_p11 = scmp.ne.s32.totalorder %s21_s8, %s2119_s1  ;;  %p2125_p13 = scmp.lt.s32.totalorder %s2119_s1, %s2119_s1 }
  0x1f   :  { %p2126_p0 = por %p2125_p13, %p2124_p12 }
  0x21   :  { %p2127_p1 = pnand %p2126_p0, %p2120_p11 }
  0x23   :  { %2130 = shalt.err (!%p2127_p1)
}
  0x24   :  { %23 = dma.hbm_to_vmem [thread:$0]  %s2340_s0, 256, %s21_s8, [#allocation3]  }
  0x25   :  { %s2131_s22 = scalar_lea.hbm %s2342_s2, 3072 }
  0x26   :  { %p2132_p2 = scmp.ne.s32.totalorder %s2342_s2, %s2131_s22  ;;  %p2135_p3 = scmp.lt.u32.totalorder %s2131_s22, %s2342_s2 }
  0x28   :  { %p2137_p4 = pnand %p2135_p3, %p2132_p2 }
  0x2a   :  { %2140 = shalt.err (!%p2137_p4)
}
  0x2b   :  { %s2141_s27 = scalar_lea.vmem %s42_s10, 3072  ;;  %p2146_p6 = scmp.lt.s32.totalorder %s42_s10, %s42_s10 }
  0x2c   :  { %p2142_p5 = scmp.ne.s32.totalorder %s42_s10, %s2141_s27  ;;  %p2147_p7 = scmp.lt.s32.totalorder %s2141_s27, %s2141_s27 }
  0x2e   :  { %p2148_p8 = por %p2147_p7, %p2146_p6 }
  0x30   :  { %p2149_p9 = pnand %p2148_p8, %p2142_p5 }
  0x32   :  { %2152 = shalt.err (!%p2149_p9)
}
  0x33   :  { %s2210_s0 = smov 64   ;;  %s2211_s28 = smov 4  }
  0x34   :  { %47 = dma.hbm_to_vmem [thread:$0]  %s2342_s2, 3072, %s42_s10, [#allocation6], %s2210_s0, %s2210_s0, %s2211_s28  }
  0x35   :  { %s2212_s6 = smov [#allocation8]   ;;  %s2153_s11 = scalar_lea.hbm %s2343_s3, 4096 }
  0x36   :  { %s53_s7 = sshll.u32 %s2212_s6, 4  ;;  %p2154_p10 = scmp.ne.s32.totalorder %s2343_s3, %s2153_s11  ;;  %s54_s7 = int_to_ptr.vmem [resolvable:$true] %s53_s7 }
  0x37   :  { %p2157_p11 = scmp.lt.u32.totalorder %s2153_s11, %s2343_s3 }
  0x39   :  { %p2159_p12 = pnand %p2157_p11, %p2154_p10 }
  0x3b   :  { %2162 = shalt.err (!%p2159_p12)
}
  0x3c   :  { %s2163_s16 = scalar_lea.vmem %s54_s7, 4096  ;;  %p2168_p0 = scmp.lt.s32.totalorder %s54_s7, %s54_s7 }
  0x3d   :  { %p2164_p13 = scmp.ne.s32.totalorder %s54_s7, %s2163_s16  ;;  %p2169_p1 = scmp.lt.s32.totalorder %s2163_s16, %s2163_s16 }
  0x3f   :  { %p2170_p2 = por %p2169_p1, %p2168_p0 }
  0x41   :  { %p2171_p3 = pnand %p2170_p2, %p2164_p13 }
  0x43   :  { %2174 = shalt.err (!%p2171_p3)
}
  0x44   :  { %59 = dma.hbm_to_vmem [thread:$0]  %s2343_s3, 4096, %s54_s7, [#allocation9], %s2210_s0, %s2210_s0, %s2211_s28  }
  0x45   :  { %2197 = dma.done.wait [#allocation3], 256  }
  0x46   :  { %2198 = vsyncadd [#allocation3], 4294967040 }
  0x47   :  { %2199 = dma.done.wait [#allocation6], 15360  }
  0x48   :  { %2200 = vsyncadd [#allocation6], 4294951936 }
  0x49   :  { %2201 = dma.done.wait [#allocation9], 4096  }
  0x4a   :  { %2202 = vsyncadd [#allocation9], 4294963200  ;;  %v1899_v0 = vld [vmem:[#allocation5 + $0x4] ss:$12 sps:$4 sm:$0xff]   ;;  %v1901_v1 = vld [vmem:[#allocation5] ss:$12 sps:$4 sm:$0xff]  }
  0x4b   :  { %731 = vmatprep.subr.bf16.mxu0 %v1899_v0  ;;  %v1902_v2 = vld [vmem:[#allocation5 + $0x1c] ss:$12 sps:$4 sm:$0xff]   ;;  %v1904_v3 = vld [vmem:[#allocation5 + $0x18] ss:$12 sps:$4 sm:$0xff]   ;;  %v1905_v4 = vld [vmem:[#allocation5 + $0x34] ss:$12 sps:$4 sm:$0xff]  }
  0x4c   :  { %732 = vmatpush1.bf16.msra.mxu0 %v1901_v1  ;;  %v1907_v5 = vld [vmem:[#allocation5 + $0x30] ss:$12 sps:$4 sm:$0xff]   ;;  %v1908_v6 = vld [vmem:[#allocation5 + $0x4c] ss:$12 sps:$4 sm:$0xff]   ;;  %v1910_v7 = vld [vmem:[#allocation5 + $0x48] ss:$12 sps:$4 sm:$0xff]  }
  0x4d   :  { %733 = vmatprep.subr.bf16.mxu0 %v1902_v2  ;;  %v1923_v8 = vld [vmem:[#allocation5 + $0xc8] ss:$12 sps:$4 sm:$0xff]   ;;  %v1911_v9 = vld [vmem:[#allocation5 + $0x64] ss:$12 sps:$4 sm:$0xff]   ;;  %v1913_v10 = vld [vmem:[#allocation5 + $0x60] ss:$12 sps:$4 sm:$0xff]  }
  0x4e   :  { %1742 = vmatprep.subr.bf16.mxu1 %v1923_v8  ;;  %v1926_v11 = vld [vmem:[#allocation5 + $0x8] ss:$12 sps:$4 sm:$0xff]   ;;  %v1928_v12 = vld [vmem:[#allocation5 + $0xe0] ss:$12 sps:$4 sm:$0xff]   ;;  %v1933_v15 = vld [vmem:[#allocation5 + $0xf8] ss:$12 sps:$4 sm:$0xff]  }
  0x4f   :  { %v1914_v13 = vld [vmem:[#allocation5 + $0x7c] ss:$12 sps:$4 sm:$0xff]   ;;  %1743 = vmatpush3.bf16.msra.mxu1 %v1926_v11  ;;  %v1931_v14 = vld [vmem:[#allocation5 + $0x20] ss:$12 sps:$4 sm:$0xff]   ;;  %v1916_v16 = vld [vmem:[#allocation5 + $0x78] ss:$12 sps:$4 sm:$0xff]  }
  0x50   :  { %734 = vmatpush1.bf16.msra.mxu0 %v1904_v3  ;;  %1744 = vmatprep.subr.bf16.mxu1 %v1928_v12  ;;  %v1917_v17 = vld [vmem:[#allocation5 + $0x94] ss:$12 sps:$4 sm:$0xff]   ;;  %v1936_v18 = vld [vmem:[#allocation5 + $0x38] ss:$12 sps:$4 sm:$0xff]   ;;  %v1938_v19 = vld [vmem:[#allocation5 + $0x110] ss:$12 sps:$4 sm:$0xff]  }
  0x51   :  { %735 = vmatprep.subr.bf16.mxu0 %v1905_v4  ;;  %v1919_v20 = vld [vmem:[#allocation5 + $0x90] ss:$12 sps:$4 sm:$0xff]   ;;  %v1920_v21 = vld [vmem:[#allocation5 + $0xac] ss:$12 sps:$4 sm:$0xff]   ;;  %v1943_v23 = vld [vmem:[#allocation5 + $0x128] ss:$12 sps:$4 sm:$0xff]  }
  0x52   :  { %v1941_v22 = vld [vmem:[#allocation5 + $0x50] ss:$12 sps:$4 sm:$0xff]   ;;  %v1922_v24 = vld [vmem:[#allocation5 + $0xa8] ss:$12 sps:$4 sm:$0xff]   ;;  %v1948_v27 = vld [vmem:[#allocation5 + $0x140] ss:$12 sps:$4 sm:$0xff]  }
  0x53   :  { %1745 = vmatpush3.bf16.msra.mxu1 %v1931_v14  ;;  %v1924_v25 = vld [vmem:[#allocation5 + $0xc4] ss:$12 sps:$4 sm:$0xff]   ;;  %v1946_v26 = vld [vmem:[#allocation5 + $0x68] ss:$12 sps:$4 sm:$0xff]   ;;  %v1927_v28 = vld [vmem:[#allocation5 + $0xc0] ss:$12 sps:$4 sm:$0xff]  }
  0x54   :  { %736 = vmatpush1.bf16.msra.mxu0 %v1907_v5  ;;  %1746 = vmatprep.subr.bf16.mxu1 %v1933_v15  ;;  %v1929_v29 = vld [vmem:[#allocation5 + $0xdc] ss:$12 sps:$4 sm:$0xff]   ;;  %v1951_v30 = vld [vmem:[#allocation5 + $0x80] ss:$12 sps:$4 sm:$0xff]   ;;  %v1953_v31 = vld [vmem:[#allocation5 + $0x158] ss:$12 sps:$4 sm:$0xff]  }
  0x55   :  { %737 = vmatprep.subr.bf16.mxu0 %v1908_v6  ;;  %v1932_v32 = vld [vmem:[#allocation5 + $0xd8] ss:$12 sps:$4 sm:$0xff]   ;;  %v1934_v33 = vld [vmem:[#allocation5 + $0xf4] ss:$12 sps:$4 sm:$0xff]   ;;  %v1958_v35 = vld [vmem:[#allocation5 + $0x170] ss:$12 sps:$4 sm:$0xff]  }
  0x56   :  { %v1956_v34 = vld [vmem:[#allocation5 + $0x98] ss:$12 sps:$4 sm:$0xff]   ;;  %v2296_v36 = vld [vmem:[#allocation2] sm:$0xff]  ;;  %s2213_s3 = smov 127   ;;  %s2214_s17 = smov 126   ;;  %vm902_vm0 = vcmask 1043456  }
  0x57   :  { %1747 = vmatpush3.bf16.msra.mxu1 %v1936_v18  ;;  %v1937_v37 = vld [vmem:[#allocation5 + $0xf0] ss:$12 sps:$4 sm:$0xff]   ;;  %v1581_v38 = vcombine.high %v2296_v36, %v2296_v36  ;;  %896 = vrot.lane.b32.xlu0 %v2296_v36, %s2213_s3  ;;  %v1939_v39 = vld [vmem:[#allocation5 + $0x10c] ss:$12 sps:$4 sm:$0xff]   ;;  %v1964_v41 = vld [vmem:[#allocation5 + $0x248] ss:$12 sps:$4 sm:$0xff]   ;;  %v1580_v44 = vcombine.low %v2296_v36, %v2296_v36 }
  0x58   :  { %738 = vmatpush1.bf16.msra.mxu0 %v1910_v7  ;;  %1748 = vmatprep.subr.bf16.mxu1 %v1938_v19  ;;  %v1961_v40 = vld [vmem:[#allocation5 + $0xb0] ss:$12 sps:$4 sm:$0xff]   ;;  %v1942_v42 = vld [vmem:[#allocation5 + $0x108] ss:$12 sps:$4 sm:$0xff]   ;;  %v1970_v46 = vld [vmem:[#allocation5 + $0x260] ss:$12 sps:$4 sm:$0xff]  }
  0x59   :  { %739 = vmatprep.subr.bf16.mxu0 %v1911_v9  ;;  %911 = vrot.lane.b32.xlu1 %v2296_v36, %s2214_s17  ;;  %v1944_v43 = vld [vmem:[#allocation5 + $0x124] ss:$12 sps:$4 sm:$0xff]   ;;  %v1969_v45 = vld [vmem:[#allocation5 + $0x188] ss:$12 sps:$4 sm:$0xff]   ;;  %v1947_v47 = vld [vmem:[#allocation5 + $0x120] ss:$12 sps:$4 sm:$0xff]  }
  0x5a   :  { %845 = vmatprep.mubr.bf16.mxu1 %v1581_v38  ;;  %763 = vmatprep.mubr.bf16.mxu0 %v1581_v38  ;;  %v1949_v48 = vld [vmem:[#allocation5 + $0x13c] ss:$12 sps:$4 sm:$0xff]   ;;  %v1974_v49 = vld [vmem:[#allocation5 + $0x1a0] ss:$12 sps:$4 sm:$0xff]   ;;  %v1975_v50 = vld [vmem:[#allocation5 + $0x278] ss:$12 sps:$4 sm:$0xff]  }
  0x5b   :  { %1749 = vmatpush3.bf16.msra.mxu1 %v1941_v22  ;;  %v1952_v51 = vld [vmem:[#allocation5 + $0x138] ss:$12 sps:$4 sm:$0xff]   ;;  %v1954_v52 = vld [vmem:[#allocation5 + $0x154] ss:$12 sps:$4 sm:$0xff]   ;;  %v1980_v54 = vld [vmem:[#allocation5 + $0x290] ss:$12 sps:$4 sm:$0xff]  }
  0x5c   :  { %740 = vmatpush1.bf16.msra.mxu0 %v1913_v10  ;;  %1750 = vmatprep.subr.bf16.mxu1 %v1943_v23  ;;  %v1979_v53 = vld [vmem:[#allocation5 + $0x1b8] ss:$12 sps:$4 sm:$0xff]   ;;  %v1957_v55 = vld [vmem:[#allocation5 + $0x150] ss:$12 sps:$4 sm:$0xff]   ;;  %v1985_v58 = vld [vmem:[#allocation5 + $0x2a8] ss:$12 sps:$4 sm:$0xff]  }
  0x5d   :  { %741 = vmatprep.subr.bf16.mxu0 %v1914_v13  ;;  %v1984_v56 = vld [vmem:[#allocation5 + $0x1d0] ss:$12 sps:$4 sm:$0xff]   ;;  %v1959_v57 = vld [vmem:[#allocation5 + $0x16c] ss:$12 sps:$4 sm:$0xff]   ;;  %v1962_v59 = vld [vmem:[#allocation5 + $0x168] ss:$12 sps:$4 sm:$0xff]  }
  0x5e   :  { %v1967_v60 = vld [vmem:[#allocation5 + $0x184] ss:$12 sps:$4 sm:$0xff]   ;;  %v1989_v61 = vld [vmem:[#allocation5 + $0x1e8] ss:$12 sps:$4 sm:$0xff]   ;;  %v1990_v62 = vld [vmem:[#allocation5 + $0x2c0] ss:$12 sps:$4 sm:$0xff]  }
  0x5f   :  { %1751 = vmatpush3.bf16.msra.mxu1 %v1946_v26  ;;  %v1965_v63 = vld [vmem:[#allocation5 + $0x180] ss:$12 sps:$4 sm:$0xff]   ;;  %v1973_v0 = vld [vmem:[#allocation5 + $0x19c] ss:$12 sps:$4 sm:$0xff]   ;;  %v1995_v2 = vld [vmem:[#allocation5 + $0x2d8] ss:$12 sps:$4 sm:$0xff]  }
  0x60   :  { %742 = vmatpush1.bf16.msra.mxu0 %v1916_v16  ;;  %1752 = vmatprep.subr.bf16.mxu1 %v1948_v27  ;;  %v1994_v1 = vld [vmem:[#allocation5 + $0x200] ss:$12 sps:$4 sm:$0xff]   ;;  %v2306_v3 = vld [vmem:[#allocation2 + $0x8] sm:$0xff]  ;;  %v1981_v12 = vld [vmem:[#allocation5 + $0x1c8] ss:$12 sps:$4 sm:$0xff]   ;;  %vm904_vm1 = vcmask 1039360  }
  0x61   :  { %743 = vmatprep.subr.bf16.mxu0 %v1917_v17  ;;  %v1583_v4 = vcombine.high %v2306_v3, %v2306_v3  ;;  %898 = vrot.lane.b32.xlu0 %v2306_v3, %s2213_s3  ;;  %v1971_v5 = vld [vmem:[#allocation5 + $0x198] ss:$12 sps:$4 sm:$0xff]   ;;  %v1978_v7 = vld [vmem:[#allocation5 + $0x1b4] ss:$12 sps:$4 sm:$0xff]   ;;  %v2000_v8 = vld [vmem:[#allocation5 + $0x2f0] ss:$12 sps:$4 sm:$0xff]   ;;  %v2316_v13 = vcombine.low %v2306_v3, %v2306_v3 }
  0x62   :  { %913 = vrot.lane.b32.xlu1 %v2306_v3, %s2214_s17  ;;  %v1999_v6 = vld [vmem:[#allocation5 + $0x218] ss:$12 sps:$4 sm:$0xff]   ;;  %v1976_v9 = vld [vmem:[#allocation5 + $0x1b0] ss:$12 sps:$4 sm:$0xff]   ;;  %v1986_v16 = vld [vmem:[#allocation5 + $0x1e0] ss:$12 sps:$4 sm:$0xff]  }
  0x63   :  { %1753 = vmatpush3.bf16.msra.mxu1 %v1951_v30  ;;  %v2004_v10 = vld [vmem:[#allocation5 + $0x230] ss:$12 sps:$4 sm:$0xff]   ;;  %v1983_v11 = vld [vmem:[#allocation5 + $0x1cc] ss:$12 sps:$4 sm:$0xff]   ;;  %v2031_v15 = vld [vmem:[#allocation8 + $0x40] sm:$0xff]   ;;  %vm918_vm2 = vcmask 1031168  }
  0x64   :  { %744 = vmatpush1.bf16.msra.mxu0 %v1919_v20  ;;  %1754 = vmatprep.subr.bf16.mxu1 %v1953_v31  ;;  %v1988_v14 = vld [vmem:[#allocation5 + $0x1e4] ss:$12 sps:$4 sm:$0xff]   ;;  %v1993_v18 = vld [vmem:[#allocation5 + $0x1fc] ss:$12 sps:$4 sm:$0xff]   ;;  %v1998_v23 = vld [vmem:[#allocation5 + $0x214] ss:$12 sps:$4 sm:$0xff]  }
  0x65   :  { %745 = vmatprep.subr.bf16.mxu0 %v1920_v21  ;;  %v2032_v17 = vld [vmem:[#allocation8] sm:$0xff]   ;;  %v2033_v19 = vld [vmem:[#allocation8 + $0x48] sm:$0xff]   ;;  %v2035_v21 = vld [vmem:[#allocation8 + $0x50] sm:$0xff]   ;;  %vm1245_vm3 = vcmask 1046528   ;;  %vm2216_vm4 = vmmov 0   ;;  %s2217_s19 = smov [#allocation10]  }
  0x66   :  { %v2034_v20 = vld [vmem:[#allocation8 + $0x8] sm:$0xff]   ;;  %v1991_v22 = vld [vmem:[#allocation5 + $0x1f8] ss:$12 sps:$4 sm:$0xff]   ;;  %v1996_v26 = vld [vmem:[#allocation5 + $0x210] ss:$12 sps:$4 sm:$0xff]   ;;  %s1569_s20 = sshll.u32 %s2217_s19, 4  ;;  %s1570_s20 = int_to_ptr.vmem [resolvable:$true] %s1569_s20 }
  0x67   :  { %1755 = vmatpush3.bf16.msra.mxu1 %v1956_v34  ;;  %v2003_v27 = vld [vmem:[#allocation5 + $0x22c] ss:$12 sps:$4 sm:$0xff]   ;;  %v2001_v30 = vld [vmem:[#allocation5 + $0x228] ss:$12 sps:$4 sm:$0xff]   ;;  %v2009_v31 = vld [vmem:[#allocation5 + $0x244] ss:$12 sps:$4 sm:$0xff]   ;;  %p2180_p5 = scmp.lt.s32.totalorder %s1570_s20, %s1570_s20 }
  0x68   :  { %746 = vmatpush1.bf16.msra.mxu0 %v1922_v24  ;;  %1756 = vmatprep.subr.bf16.mxu1 %v1958_v35  ;;  %v2036_v24 = vld [vmem:[#allocation8 + $0x10] sm:$0xff]   ;;  %v2007_v34 = vld [vmem:[#allocation5 + $0x240] ss:$12 sps:$4 sm:$0xff]   ;;  %v2012_v35 = vld [vmem:[#allocation5 + $0x25c] ss:$12 sps:$4 sm:$0xff]   ;;  %s2175_s21 = scalar_lea.vmem %s1570_s20, 128 }
  0x69   :  { %747 = vmatprep.subr.bf16.mxu0 %v1924_v25  ;;  %v2037_v25 = vld [vmem:[#allocation8 + $0x58] sm:$0xff]   ;;  %v2043_v38 = vld [vmem:[#allocation8 + $0x70] sm:$0xff]   ;;  %p2176_p4 = scmp.ne.s32.totalorder %s1570_s20, %s2175_s21  ;;  %p2181_p6 = scmp.lt.s32.totalorder %s2175_s21, %s2175_s21 }
  0x6b   :  { %1757 = vmatpush3.bf16.msra.mxu1 %v1961_v40  ;;  %v2015_v40 = vld [vmem:[#allocation5 + $0x274] ss:$12 sps:$4 sm:$0xff]   ;;  %p2182_p7 = por %p2181_p6, %p2180_p5 }
  0x6c   :  { %748 = vmatpush1.bf16.msra.mxu0 %v1927_v28  ;;  %1764 = vmatprep.subr.bf16.mxu1 %v1964_v41  ;;  %v2038_v28 = vld [vmem:[#allocation8 + $0x18] sm:$0xff]   ;;  %v2044_v41 = vld [vmem:[#allocation8 + $0x30] sm:$0xff]  }
  0x6d   :  { %749 = vmatprep.subr.bf16.mxu0 %v1929_v29  ;;  %v2039_v29 = vld [vmem:[#allocation8 + $0x60] sm:$0xff]   ;;  %p2183_p8 = pnand %p2182_p7, %p2176_p4 }
  0x6e   :  { %846 = vmatmul.mubr.bf16.vlgmr.msra.gmra.mrb[0].mxu1 %v1580_v44 }
  0x6f   :  { %1765 = vmatpush3.bf16.msra.mxu1 %v1969_v45  ;;  %885 = vmatprep.mubr.bf16.mxu1 %v1583_v4  ;;  %v2046_v45 = vld [vmem:[#allocation8 + $0x38] sm:$0xff]  }
  0x70   :  { %750 = vmatpush1.bf16.msra.mxu0 %v1932_v32  ;;  %1766 = vmatprep.subr.bf16.mxu1 %v1970_v46  ;;  %v2040_v32 = vld [vmem:[#allocation8 + $0x20] sm:$0xff]  }
  0x71   :  { %751 = vmatprep.subr.bf16.mxu0 %v1934_v33  ;;  %v2041_v33 = vld [vmem:[#allocation8 + $0x68] sm:$0xff]   ;;  %v2047_v46 = vld [vmem:[#allocation8 + $0xc0] sm:$0xff]  }
  0x73   :  { %1767 = vmatpush3.bf16.msra.mxu1 %v1974_v49  ;;  %v2019_v49 = vld [vmem:[#allocation5 + $0x2a0] ss:$12 sps:$4 sm:$0xff]  }
  0x74   :  { %752 = vmatpush1.bf16.msra.mxu0 %v1937_v37  ;;  %1768 = vmatprep.subr.bf16.mxu1 %v1975_v50  ;;  %v2042_v37 = vld [vmem:[#allocation8 + $0x28] sm:$0xff]  }
  0x75   :  { %753 = vmatprep.subr.bf16.mxu0 %v1939_v39  ;;  %v2010_v39 = vld [vmem:[#allocation5 + $0x258] ss:$12 sps:$4 sm:$0xff]   ;;  %v2024_v50 = vld [vmem:[#allocation5 + $0x2bc] ss:$12 sps:$4 sm:$0xff]  }
  0x77   :  { %1769 = vmatpush3.bf16.msra.mxu1 %v1979_v53  ;;  %v2025_v53 = vld [vmem:[#allocation5 + $0x2d0] ss:$12 sps:$4 sm:$0xff]  }
  0x78   :  { %754 = vmatpush1.bf16.msra.mxu0 %v1942_v42  ;;  %1770 = vmatprep.subr.bf16.mxu1 %v1980_v54  ;;  %v2045_v42 = vld [vmem:[#allocation8 + $0x78] sm:$0xff]  }
  0x79   :  { %755 = vmatprep.subr.bf16.mxu0 %v1944_v43  ;;  %v2013_v43 = vld [vmem:[#allocation5 + $0x270] ss:$12 sps:$4 sm:$0xff]   ;;  %v2030_v54 = vld [vmem:[#allocation5 + $0x2ec] ss:$12 sps:$4 sm:$0xff]  }
  0x7b   :  { %1771 = vmatpush3.bf16.msra.mxu1 %v1984_v56  ;;  %v2071_v56 = vld [vmem:[#allocation7 + $0x40] sm:$0xff]  }
  0x7c   :  { %756 = vmatpush1.bf16.msra.mxu0 %v1947_v47  ;;  %1772 = vmatprep.subr.bf16.mxu1 %v1985_v58  ;;  %v2016_v47 = vld [vmem:[#allocation5 + $0x288] ss:$12 sps:$4 sm:$0xff]  }
  0x7d   :  { %757 = vmatprep.subr.bf16.mxu0 %v1949_v48  ;;  %v2021_v48 = vld [vmem:[#allocation5 + $0x2a4] ss:$12 sps:$4 sm:$0xff]   ;;  %v2073_v58 = vld [vmem:[#allocation7 + $0x48] sm:$0xff]  }
  0x7f   :  { %1773 = vmatpush3.bf16.msra.mxu1 %v1989_v61 }
  0x80   :  { %758 = vmatpush1.bf16.msra.mxu0 %v1952_v51  ;;  %1774 = vmatprep.subr.bf16.mxu1 %v1990_v62  ;;  %v2022_v51 = vld [vmem:[#allocation5 + $0x2b8] ss:$12 sps:$4 sm:$0xff]  }
  0x81   :  { %759 = vmatprep.subr.bf16.mxu0 %v1954_v52  ;;  %v2027_v52 = vld [vmem:[#allocation5 + $0x2d4] ss:$12 sps:$4 sm:$0xff]  }
  0x83   :  { %1775 = vmatpush3.bf16.msra.mxu1 %v1994_v1 }
  0x84   :  { %760 = vmatpush1.bf16.msra.mxu0 %v1957_v55  ;;  %1776 = vmatprep.subr.bf16.mxu1 %v1995_v2  ;;  %v2028_v55 = vld [vmem:[#allocation5 + $0x2e8] ss:$12 sps:$4 sm:$0xff]  }
  0x85   :  { %761 = vmatprep.subr.bf16.mxu0 %v1959_v57  ;;  %v2072_v57 = vld [vmem:[#allocation7] sm:$0xff]  }
  0x87   :  { %1777 = vmatpush3.bf16.msra.mxu1 %v1999_v6 }
  0x88   :  { %762 = vmatpush1.bf16.msra.mxu0 %v1962_v59  ;;  %1778 = vmatprep.subr.bf16.mxu1 %v2000_v8  ;;  %v2074_v59 = vld [vmem:[#allocation7 + $0x8] sm:$0xff]  }
  0x89   :  { %772 = vmatprep.subr.bf16.mxu0 %v1967_v60  ;;  %v2075_v60 = vld [vmem:[#allocation7 + $0x50] sm:$0xff]  }
  0x8b   :  { %764 = vmatmul.mubr.bf16.vlgmr.msra.gmra.mrb[0].mxu0 %v1580_v44  ;;  %1779 = vmatpush3.bf16.msra.mxu1 %v2004_v10  ;;  %v2018_v44 = vld [vmem:[#allocation5 + $0x28c] ss:$12 sps:$4 sm:$0xff]  }
  0x8c   :  { %773 = vmatpush1.bf16.msra.mxu0 %v1965_v63  ;;  %804 = vmatprep.mubr.bf16.mxu0 %v1583_v4  ;;  %v2076_v63 = vld [vmem:[#allocation7 + $0x10] sm:$0xff]   ;;  %v2078_v4 = vld [vmem:[#allocation7 + $0x18] sm:$0xff]  }
  0x8d   :  { %774 = vmatprep.subr.bf16.mxu0 %v1973_v0  ;;  %1786 = vmatprep.subr.bf16.mxu1 %v2031_v15  ;;  %v2077_v0 = vld [vmem:[#allocation7 + $0x58] sm:$0xff]  }
  0x8e   :  { %886 = vmatmul.mubr.bf16.vlgmr.msra.gmra.mrb[4].mxu1 %v2316_v13 }
  0x8f   :  { %1787 = vmatpush3.bf16.msra.mxu1 %v2032_v17 }
  0x90   :  { %775 = vmatpush1.bf16.msra.mxu0 %v1971_v5  ;;  %1788 = vmatprep.subr.bf16.mxu1 %v2033_v19 }
  0x91   :  { %776 = vmatprep.subr.bf16.mxu0 %v1978_v7  ;;  %v2079_v7 = vld [vmem:[#allocation7 + $0x60] sm:$0xff]  }
  0x93   :  { %1789 = vmatpush3.bf16.msra.mxu1 %v2034_v20 }
  0x94   :  { %777 = vmatpush1.bf16.msra.mxu0 %v1976_v9  ;;  %1790 = vmatprep.subr.bf16.mxu1 %v2035_v21 }
  0x95   :  { %778 = vmatprep.subr.bf16.mxu0 %v1983_v11 }
  0x97   :  { %1791 = vmatpush3.bf16.msra.mxu1 %v2036_v24 }
  0x98   :  { %779 = vmatpush1.bf16.msra.mxu0 %v1981_v12  ;;  %1792 = vmatprep.subr.bf16.mxu1 %v2037_v25 }
  0x99   :  { %780 = vmatprep.subr.bf16.mxu0 %v1988_v14  ;;  %v2080_v14 = vld [vmem:[#allocation7 + $0x20] sm:$0xff]  }
  0x9b   :  { %1793 = vmatpush3.bf16.msra.mxu1 %v2038_v28  ;;  %v2049_v28 = vld [vmem:[#allocation8 + $0xc8] sm:$0xff]  }
  0x9c   :  { %781 = vmatpush1.bf16.msra.mxu0 %v1986_v16  ;;  %1794 = vmatprep.subr.bf16.mxu1 %v2039_v29  ;;  %v2050_v29 = vld [vmem:[#allocation8 + $0x88] sm:$0xff]  }
  0x9d   :  { %782 = vmatprep.subr.bf16.mxu0 %v1993_v18  ;;  %v2081_v18 = vld [vmem:[#allocation7 + $0x68] sm:$0xff]  }
  0x9f   :  { %1795 = vmatpush3.bf16.msra.mxu1 %v2040_v32  ;;  %v2054_v32 = vld [vmem:[#allocation8 + $0x98] sm:$0xff]  }
  0xa0   :  { %783 = vmatpush1.bf16.msra.mxu0 %v1991_v22  ;;  %1796 = vmatprep.subr.bf16.mxu1 %v2041_v33  ;;  %v2082_v22 = vld [vmem:[#allocation7 + $0x28] sm:$0xff]   ;;  %v2055_v33 = vld [vmem:[#allocation8 + $0xe0] sm:$0xff]  }
  0xa1   :  { %784 = vmatprep.subr.bf16.mxu0 %v1998_v23  ;;  %v2083_v23 = vld [vmem:[#allocation7 + $0x70] sm:$0xff]  }
  0xa3   :  { %1797 = vmatpush3.bf16.msra.mxu1 %v2042_v37  ;;  %v2058_v37 = vld [vmem:[#allocation8 + $0xa8] sm:$0xff]  }
  0xa4   :  { %785 = vmatpush1.bf16.msra.mxu0 %v1996_v26  ;;  %1798 = vmatprep.subr.bf16.mxu1 %v2043_v38  ;;  %v2059_v38 = vld [vmem:[#allocation8 + $0xf0] sm:$0xff]  }
  0xa5   :  { %786 = vmatprep.subr.bf16.mxu0 %v2003_v27  ;;  %v2048_v27 = vld [vmem:[#allocation8 + $0x80] sm:$0xff]  }
  0xa7   :  { %1799 = vmatpush3.bf16.msra.mxu1 %v2044_v41  ;;  %v2061_v41 = vld [vmem:[#allocation8 + $0xf8] sm:$0x7f]  }
  0xa8   :  { %787 = vmatpush1.bf16.msra.mxu0 %v2001_v30  ;;  %1800 = vmatprep.subr.bf16.mxu1 %v2045_v42  ;;  %v2052_v30 = vld [vmem:[#allocation8 + $0x90] sm:$0xff]   ;;  %v2086_v42 = vld [vmem:[#allocation7 + $0x38] sm:$0xff]  }
  0xa9   :  { %788 = vmatprep.subr.bf16.mxu0 %v2009_v31  ;;  %v2053_v31 = vld [vmem:[#allocation8 + $0xd8] sm:$0xff]  }
  0xab   :  { %1801 = vmatpush3.bf16.msra.mxu1 %v2046_v45  ;;  %v2063_v45 = vld [vmem:[#allocation7 + $0x80] sm:$0xff]  }
  0xac   :  { %789 = vmatpush1.bf16.msra.mxu0 %v2007_v34  ;;  %1808 = vmatprep.subr.bf16.mxu1 %v2047_v46  ;;  %v2056_v34 = vld [vmem:[#allocation8 + $0xa0] sm:$0xff]   ;;  %v2215_v46 = vmov 0.0  }
  0xad   :  { %790 = vmatprep.subr.bf16.mxu0 %v2012_v35  ;;  %v2057_v35 = vld [vmem:[#allocation8 + $0xe8] sm:$0xff]  }
  0xb0   :  { %791 = vmatpush1.bf16.msra.mxu0 %v2010_v39  ;;  %v2060_v39 = vld [vmem:[#allocation8 + $0xb0] sm:$0xff]  }
  0xb1   :  { %792 = vmatprep.subr.bf16.mxu0 %v2015_v40  ;;  %v2085_v40 = vld [vmem:[#allocation7 + $0x78] sm:$0xff]  }
  0xb4   :  { %793 = vmatpush1.bf16.msra.mxu0 %v2013_v43  ;;  %v2062_v43 = vld [vmem:[#allocation8 + $0xb8] sm:$0xff]  }
  0xb5   :  { %794 = vmatprep.subr.bf16.mxu0 %v2018_v44 }
  0xb8   :  { %795 = vmatpush1.bf16.msra.mxu0 %v2016_v47  ;;  %v2064_v47 = vld [vmem:[#allocation7 + $0x88] sm:$0xff]  }
  0xb9   :  { %796 = vmatprep.subr.bf16.mxu0 %v2021_v48  ;;  %v2065_v48 = vld [vmem:[#allocation7 + $0x90] sm:$0xff]  }
  0xbc   :  { %797 = vmatpush1.bf16.msra.mxu0 %v2019_v49  ;;  %v2066_v49 = vld [vmem:[#allocation7 + $0x98] sm:$0xff]  }
  0xbd   :  { %798 = vmatprep.subr.bf16.mxu0 %v2024_v50  ;;  %v2067_v50 = vld [vmem:[#allocation7 + $0xa0] sm:$0xff]  }
  0xc0   :  { %799 = vmatpush1.bf16.msra.mxu0 %v2022_v51  ;;  %v2068_v51 = vld [vmem:[#allocation7 + $0xa8] sm:$0xff]  }
  0xc1   :  { %800 = vmatprep.subr.bf16.mxu0 %v2027_v52  ;;  %v2069_v52 = vld [vmem:[#allocation7 + $0xb0] sm:$0xff]  }
  0xc4   :  { %801 = vmatpush1.bf16.msra.mxu0 %v2025_v53  ;;  %v2070_v53 = vld [vmem:[#allocation7 + $0xb8] sm:$0xff]  }
  0xc5   :  { %802 = vmatprep.subr.bf16.mxu0 %v2030_v54 }
  0xc8   :  { %803 = vmatpush1.bf16.msra.mxu0 %v2028_v55 }
  0xc9   :  { %1830 = vmatprep.subr.bf16.mxu0 %v2071_v56  ;;  %v897_v61 = vpop.permute.xlu0 %896 }
  0xca   :  { %v900_v1 = vrot.slane %v897_v61, 4 }
  0xcb   :  { %805 = vmatmul.mubr.bf16.vlgmr.msra.gmra.mrb[0].mxu0 %v2316_v13  ;;  %v912_v62 = vpop.permute.xlu1 %911 }
  0xcc   :  { %1831 = vmatpush3.bf16.msra.mxu0 %v2072_v57  ;;  %v915_v2 = vrot.slane %v912_v62, 4 }
  0xcd   :  { %1832 = vmatprep.subr.bf16.mxu0 %v2073_v58 }
  0xd0   :  { %1833 = vmatpush3.bf16.msra.mxu0 %v2074_v59 }
  0xd1   :  { %1834 = vmatprep.subr.bf16.mxu0 %v2075_v60 }
  0xd3   :  { %v899_v5 = vpop.permute.xlu0 %898 }
  0xd4   :  { %1835 = vmatpush3.bf16.msra.mxu0 %v2076_v63  ;;  %v914_v6 = vpop.permute.xlu1 %913  ;;  %v901_v8 = vrot.slane %v899_v5, 4 }
  0xd5   :  { %1836 = vmatprep.subr.bf16.mxu0 %v2077_v0  ;;  %v916_v9 = vrot.slane %v914_v6, 4 }
  0xd6   :  { %v903_v10 = vsel %vm902_vm0, %v900_v1, %v901_v8  ;;  %v906_v11 = vsel %vm904_vm1, %v899_v5, %v901_v8 }
  0xd7   :  { %v917_v12 = vsel %vm902_vm0, %v915_v2, %v916_v9  ;;  %v920_v13 = vsel %vm918_vm2, %v914_v6, %v916_v9  ;;  %v905_v15 = vsel %vm904_vm1, %v897_v61, %v903_v10  ;;  %v910_v16 = vmax.bf16 %v906_v11, %v2306_v3  ;;  %v2084_v3 = vld [vmem:[#allocation7 + $0x30] sm:$0xff]  }
  0xd8   :  { %1837 = vmatpush3.bf16.msra.mxu0 %v2078_v4  ;;  %v919_v17 = vsel %vm918_vm2, %v912_v62, %v917_v12  ;;  %v909_v19 = vmax.bf16 %v905_v15, %v2296_v36  ;;  %v2051_v36 = vld [vmem:[#allocation8 + $0xd0] sm:$0xff]  }
  0xd9   :  { %1838 = vmatprep.subr.bf16.mxu0 %v2079_v7  ;;  %v924_v20 = vmax.bf16 %v920_v13, %v910_v16 }
  0xda   :  { %v923_v21 = vmax.bf16 %v919_v17, %v909_v19 }
  0xdb   :  { %v1683_v24 = vcombine.high %v924_v20, %v924_v20  ;;  %v1682_v44 = vcombine.low %v924_v20, %v924_v20 }
  0xdc   :  { %1839 = vmatpush3.bf16.msra.mxu0 %v2080_v14  ;;  %v1681_v25 = vcombine.high %v923_v21, %v923_v21  ;;  %v1680_v26 = vcombine.low %v923_v21, %v923_v21 }
  0xdd   :  { %1840 = vmatprep.subr.bf16.mxu0 %v2081_v18 }
  0xde   :  { %1281 = vmatprep.mubr.bf16.mxu1 %v1681_v25 }
  0xdf   :  { %1282 = vmatmul.mubr.bf16.vlgmr.msra.gmra.mrb[8].mxu1 %v1680_v26 }
  0xe0   :  { %1841 = vmatpush3.bf16.msra.mxu0 %v2082_v22  ;;  %1809 = vmatpush3.bf16.msra.mxu1 %v2048_v27 }
  0xe1   :  { %1842 = vmatprep.subr.bf16.mxu0 %v2083_v23  ;;  %1716 = vmatprep.mubr.msk.bf16.mxu1 %vm918_vm2, %v1683_v24 }
  0xe2   :  { %1810 = vmatprep.subr.bf16.mxu1 %v2049_v28 }
  0xe4   :  { %1843 = vmatpush3.bf16.msra.mxu0 %v2084_v3  ;;  %1811 = vmatpush3.bf16.msra.mxu1 %v2050_v29  ;;  %v1741_v29 = vld [vmem:[%s2344_s4] ss:$0 sm:$0xff] }
  0xe5   :  { %1812 = vmatprep.subr.bf16.mxu1 %v2051_v36  ;;  %1844 = vmatprep.subr.bf16.mxu0 %v2085_v40 }
  0xe8   :  { %1813 = vmatpush3.bf16.msra.mxu1 %v2052_v30  ;;  %1845 = vmatpush3.bf16.msra.mxu0 %v2086_v42 }
  0xe9   :  { %1814 = vmatprep.subr.bf16.mxu1 %v2053_v31 }
  0xec   :  { %1815 = vmatpush3.bf16.msra.mxu1 %v2054_v32 }
  0xed   :  { %1816 = vmatprep.subr.bf16.mxu1 %v2055_v33 }
  0xf0   :  { %1817 = vmatpush3.bf16.msra.mxu1 %v2056_v34 }
  0xf1   :  { %1818 = vmatprep.subr.bf16.mxu1 %v2057_v35 }
  0xf4   :  { %1819 = vmatpush3.bf16.msra.mxu1 %v2058_v37 }
  0xf5   :  { %1820 = vmatprep.subr.bf16.mxu1 %v2059_v38 }
  0xf8   :  { %1821 = vmatpush3.bf16.msra.mxu1 %v2060_v39 }
  0xf9   :  { %1885 = vmatprep.subr.msk.bf16.mxu1 %vm1245_vm3, %v2061_v41 }
  0xfc   :  { %1823 = vmatpush3.bf16.msra.mxu1 %v2062_v43 }
  0xfd   :  { %1861 = vmatprep.subr.bf16.mxu1 %v2215_v46 }
  0xff   :  { %1322 = vmatmul.mubr.bf16.vlgmr.msra.gmra.mrb[12].mxu1 %v1682_v44 }
 0x100   :  { %1862 = vmatpush3.bf16.msra.mxu1 %v2063_v45  ;;  %1877 = vmatprep.mubr.msk.bf16.mxu1 %vm2216_vm4, %v2215_v46 }
 0x101   :  { %1863 = vmatprep.subr.bf16.mxu1 %v2215_v46 }
 0x104   :  { %1864 = vmatpush3.bf16.msra.mxu1 %v2064_v47 }
 0x105   :  { %1865 = vmatprep.subr.bf16.mxu1 %v2215_v46 }
 0x108   :  { %1866 = vmatpush3.bf16.msra.mxu1 %v2065_v48 }
 0x109   :  { %1867 = vmatprep.subr.bf16.mxu1 %v2215_v46 }
 0x10c   :  { %1868 = vmatpush3.bf16.msra.mxu1 %v2066_v49 }
 0x10d   :  { %1869 = vmatprep.subr.bf16.mxu1 %v2215_v46 }
 0x110   :  { %1870 = vmatpush3.bf16.msra.mxu1 %v2067_v50 }
 0x111   :  { %1871 = vmatprep.subr.bf16.mxu1 %v2215_v46 }
 0x114   :  { %1872 = vmatpush3.bf16.msra.mxu1 %v2068_v51 }
 0x115   :  { %1873 = vmatprep.subr.bf16.mxu1 %v2215_v46 }
 0x118   :  { %1874 = vmatpush3.bf16.msra.mxu1 %v2069_v52 }
 0x119   :  { %1875 = vmatprep.subr.bf16.mxu1 %v2215_v46 }
 0x11c   :  { %1876 = vmatpush3.bf16.msra.mxu1 %v2070_v53 }
 0x141   :  { %v1758_v54 = vpop.f32.mrb[0].mxu1 }
 0x142   :  { %v1759_v55 = vpop.f32.mrb[1].mxu1 }
 0x143   :  { %v1760_v56 = vadd.f32 %v1759_v55, %v1758_v54  ;;  %v1761_v57 = vpop.f32.mrb[2].mxu1 }
 0x144   :  { %v1762_v58 = vpop.f32.mrb[3].mxu1 }
 0x161   :  { %v1780_v59 = vpop.f32.mrb[4].mxu1 }
 0x162   :  { %v1781_v60 = vpop.f32.mrb[5].mxu1 }
 0x163   :  { %v1782_v61 = vadd.f32 %v1781_v60, %v1780_v59  ;;  %v1783_v62 = vpop.f32.mrb[6].mxu1 }
 0x164   :  { %v1784_v63 = vpop.f32.mrb[7].mxu1 }
 0x165   :  { %v888_v0 = vadd.f32 %v1782_v61, %v1760_v56 }
 0x167   :  { %v895_v1 = vpack.c.bf16 %v888_v0, %v888_v0 }
 0x169   :  { %1878 = vmatmul.mubr.bf16.vlgmr.msra.gmra.mrb[16].mxu1 %v895_v1 }
 0x19e   :  { %v806_v2 = vpop.f32.mrb[0].mxu0 }
 0x19f   :  { %v808_v4 = vpop.f32.mrb[1].mxu0  ;;  %v893_v7 = vpack.c.bf16 %v806_v2, %v806_v2 }
 0x1a0   :  { %v894_v5 = vpack.c.bf16 %v808_v4, %v808_v4  ;;  %v810_v6 = vpop.f32.mrb[2].mxu0 }
 0x1a1   :  { %v811_v8 = vpop.f32.mrb[3].mxu0 }
 0x1a2   :  { %1505 = vmatprep.mubr.bf16.mxu0 %v894_v5 }
 0x1a3   :  { %1506 = vmatmul.mubr.bf16.vlgmr.msra.gmra.mrb[4].mxu0 %v893_v7 }
 0x1b2   :  { %v1802_v9 = vpop.f32.mrb[8].mxu1 }
 0x1b3   :  { %v1803_v10 = vpop.f32.mrb[9].mxu1 }
 0x1b4   :  { %v1804_v11 = vadd.f32 %v1803_v10, %v1802_v9  ;;  %v1805_v12 = vpop.f32.mrb[10].mxu1 }
 0x1b5   :  { %v1806_v13 = vpop.f32.mrb[11].mxu1 }
 0x1d2   :  { %v1824_v14 = vpop.f32.mrb[12].mxu1 }
 0x1d3   :  { %v1825_v15 = vpop.f32.mrb[13].mxu1 }
 0x1d4   :  { %v1826_v16 = vadd.f32 %v1825_v15, %v1824_v14  ;;  %v1827_v17 = vpop.f32.mrb[14].mxu1 }
 0x1d5   :  { %v1828_v18 = vpop.f32.mrb[15].mxu1 }
 0x1d6   :  { %v1324_v19 = vadd.f32 %v1826_v16, %v1804_v11 }
 0x23c   :  { %v1547_v20 = vpop.f32.mrb[16].mxu1 }
 0x23d   :  { %v1879_v21 = vpop.f32.mrb[17].mxu1 }
 0x23e   :  { %v1550_v22 = vpop.f32.mrb[18].mxu1 }
 0x23f   :  { %v1880_v23 = vpop.f32.mrb[19].mxu1 }
 0x276   :  { %v1846_v24 = vpop.f32.mrb[4].mxu0 }
 0x277   :  { %v1847_v25 = vpop.f32.mrb[5].mxu0 }
 0x278   :  { %v1848_v26 = vadd.f32 %v1847_v25, %v1846_v24  ;;  %v1849_v27 = vpop.f32.mrb[6].mxu0 }
 0x279   :  { %v1850_v28 = vpop.f32.mrb[7].mxu0 }
 0x27a   :  { %v1508_v3 = vadd.f32 %v1848_v26, %v1324_v19 }
 0x27c   :  { %v1548_v36 = vadd.f32 %v1547_v20, %v1508_v3 }
 0x27e   :  { %v1560_v30 = vadd.f32 %v1741_v29, %v1548_v36 }
 0x280   :  { %v1561_v31 = vmax.f32 %v1560_v30, 0.0 }
 0x282   :  { %1562 = vst [vmem:[#allocation10] sm:$0xff] %v1561_v31 }
 0x283   :  { %2186 = shalt.err (!%p2183_p8)
}
 0x284   :  { %s2187_s24 = scalar_lea.hbm %s2345_s5, 128 }
 0x285   :  { %p2188_p9 = scmp.ne.s32.totalorder %s2345_s5, %s2187_s24  ;;  %p2191_p10 = scmp.lt.u32.totalorder %s2187_s24, %s2345_s5 }
 0x287   :  { %p2193_p11 = pnand %p2191_p10, %p2188_p9 }
 0x289   :  { %2196 = shalt.err (!%p2193_p11)
}
 0x28a   :  { %1572 = dma.vmem_to_hbm [thread:$0]  %s1570_s20, 128, %s2345_s5, [#allocation4]  }
 0x28b   :  { %2203 = dma.done.wait [#allocation4], 128  }
 0x28c   :  { %2204 = vsyncadd [#allocation4], 4294967168 }
 0x28d   :  { %1576 = vsyncpa [#allocation3], 1 }
 0x28e   :  { %1577 = vsyncpa [#allocation6], 1 }
 0x28f   :  { %1578 = vsyncpa [#allocation9], 1 }
 0x290   :  { %1579 = vsyncpa [#allocation4], 1 }

</bundles_post_ra>
